<compile_context>
chip_gen: v6e
topology: v6e:2x2x1
jax: 0.10.0
libtpu: 0.0.40
codegen_flags: <defaults>
</compile_context>

<pallas_src>
import functools

import jax
import jax.numpy as jnp
import numpy as np
from jax.experimental import pallas as pl
from jax.experimental.pallas import tpu as pltpu

EPS = 1e-5
KS = 3          # kernel_size
LANE = 128      # TPU lane width


def _round_up(x, m):
    return (x + m - 1) // m * m


def _make_ublock_kernel(H, W, Cout, Cout_p, Nb, n, matmul_dtype):
    """Fused (conv3x3 + InstanceNorm + ReLU) x2 kernel.

    Works on a channel-major, flattened, zero-padded image layout:
    lane q = i*n + (h_pad*Wp + w_pad) for image i of the group, n lane-dense.
    """
    Hp, Wp = H + 2, W + 2
    L = Nb * n
    inv_hw = 1.0 / float(H * W)
    # Conv1: output pixel p reads padded-input pixel p + dh*Wp + dw.
    taps1 = tuple(dh * Wp + dw for dh in range(KS) for dw in range(KS))
    # Conv2: re-pad folded into the taps -> net offset (dh-1)*Wp + (dw-1).
    taps2 = tuple((dh - 1) * Wp + (dw - 1) for dh in range(KS) for dw in range(KS))

    def build_masks():
        # Validity mask over lanes, built in-kernel (no DMA'd mask input).
        q = jax.lax.broadcasted_iota(jnp.int32, (1, L), 1).astype(jnp.float32)
        if Nb == 1:
            p = q
        else:
            img = jnp.zeros((1, L), jnp.float32)
            for i in range(1, Nb):
                img = img + jnp.where(q >= float(i * n), 1.0, 0.0)
            p = q - img * float(n)               # lane index local to its image
        # row = p // Wp without integer division: values are exact small ints in
        # f32 and (p + 0.5)/Wp is >= 0.5/Wp away from any integer, so truncation
        # of the f32 product is exact.
        row = ((p + 0.5) * (1.0 / float(Wp))).astype(jnp.int32).astype(jnp.float32)
        col = p - row * float(Wp)                # p % Wp, exact
        valid = (p < float(Hp * Wp)) & (row < float(H)) & (col < float(W))
        mask = jnp.where(valid, 1.0, 0.0)        # (1, L) f32
        if Nb == 1:
            img_masks = [mask]
        else:
            img_masks = []
            for i in range(Nb):
                ind = (q >= float(i * n)) & (q < float((i + 1) * n))
                img_masks.append(jnp.where(ind, mask, 0.0))
        return mask, img_masks

    def shifted(x, d):
        # y[:, q] = x[:, (q + d) mod L].  Cyclic is safe: for valid lanes the
        # read stays inside the image's slab (or lands on zeroed tail lanes of a
        # neighbouring image for conv2's negative offsets); invalid lanes are
        # zeroed by the InstanceNorm mask anyway.
        s = (-d) % L
        if s == 0:
            return x
        return pltpu.roll(x, s, 1)               # XLU lane rotate

    def conv_in_relu(x, taps, w_ref, mask, img_masks):
        # x: (Cpad, L) channel-major (sublane-aligned channel count).
        # One deep MXU matmul per conv: (Cout, 9*Cpad) @ (9*Cpad, L).
        patches = jnp.concatenate([shifted(x, d) for d in taps], axis=0)
        acc = jnp.dot(w_ref[...], patches, preferred_element_type=jnp.float32)
        # InstanceNorm2d (affine=False, biased variance), per image, over the
        # H*W valid lanes of that image.
        mean_full = jnp.zeros_like(acc)
        for m in img_masks:
            mean_i = jnp.sum(acc * m, axis=-1, keepdims=True) * inv_hw   # (Cout,1)
            mean_full = mean_full + mean_i * m
        cent = (acc - mean_full) * mask          # garbage / padding lanes -> 0
        sq = cent * cent
        scale_full = jnp.zeros_like(acc)
        for m in img_masks:
            var_i = jnp.sum(sq * m, axis=-1, keepdims=True) * inv_hw
            scale_full = scale_full + jax.lax.rsqrt(var_i + EPS) * m
        return jnp.maximum(cent * scale_full, 0.0)   # ReLU; invalid lanes stay 0

    def kernel(x_ref, w1_ref, w2_ref, o_ref):
        mask, img_masks = build_masks()
        y1 = conv_in_relu(x_ref[0], taps1, w1_ref, mask, img_masks)   # (Cout, L) f32
        y1 = y1.astype(matmul_dtype)
        if Cout_p != Cout:
            # Pad channels to a sublane-tile multiple so conv2's tap slabs are
            # tile-aligned as well (zero rows are free on the MXU).
            y1 = jnp.concatenate(
                [y1, jnp.zeros((Cout_p - Cout, y1.shape[-1]), y1.dtype)], axis=0)
        y2 = conv_in_relu(y1, taps2, w2_ref, mask, img_masks)
        o_ref[0] = y2                                                 # lane-dense store

    return kernel


@functools.partial(jax.jit, static_argnames=("images_per_step", "matmul_dtype"))
def ublock_forward(x_nchw, w1, b1, w2, b2, *, images_per_step=1,
                   matmul_dtype=jnp.float32):
    """Fused Ublock forward.

    x_nchw: (N, Cin, H, W); w1: (3,3,Cin,Cout) HWIO; w2: (3,3,Cout,Cout) HWIO.
    b1/b2 are accepted for API parity with nn.Conv2d but are mathematically
    cancelled by the InstanceNorm2d(affine=False) mean subtraction -> unused.
    images_per_step folds that many images into the lane axis of one grid step
    (use 1 on v7x to fill both TensorCores via the parallel grid; use >1 on
    single-TC v5e/v6e to amortize per-step overhead).
    matmul_dtype=jnp.bfloat16 is the v6e/v7x MXU-native option (f32 accumulate).
    """
    del b1, b2
    x = x_nchw.astype(jnp.float32)
    N, Cin, H, W = x.shape
    Cout = w1.shape[3]
    Hp, Wp = H + 2, W + 2
    n = _round_up(Hp * Wp, LANE)                 # lane-dense flat length per image
    Nb = images_per_step
    if N % Nb != 0:
        raise ValueError("images_per_step must divide the batch size")
    G = N // Nb
    L = Nb * n
    # Sublane tile height for the matmul/storage dtype: 8 rows f32, 16 rows bf16.
    sub = 8 * 4 // jnp.dtype(matmul_dtype).itemsize
    Cin_p = _round_up(Cin, sub)
    Cout_p = _round_up(Cout, sub)

    # Channel-major, flattened, zero-padded, lane-padded, channel-padded input:
    # xf[b, c, h*Wp + w] = x zero-padded by 1 pixel; extra channels/lanes are 0.
    xpad = jnp.pad(x, ((0, 0), (0, 0), (1, 1), (1, 1)))
    xf = jnp.pad(xpad.reshape(N, Cin, Hp * Wp),
                 ((0, 0), (0, Cin_p - Cin), (0, n - Hp * Wp)))
    # Fold Nb images into the lane axis: image i of group g owns lanes [i*n, (i+1)*n).
    xf = xf.reshape(G, Nb, Cin_p, n).transpose(0, 2, 1, 3).reshape(G, Cin_p, L)
    xf = xf.astype(matmul_dtype)

    # Tap-major weight matrices: Wmat[co, t*Cpad + ci] = w[dh, dw, ci, co],
    # zero columns for the padded channels.
    # TODO(synk): in a full U-Net pre-pack these once per parameter set instead
    # of per forward call.
    def pack(w, cpad):
        wm = jnp.transpose(w.astype(jnp.float32), (3, 0, 1, 2))   # (Cout, KS, KS, Cin)
        wm = jnp.pad(wm, ((0, 0), (0, 0), (0, 0), (0, cpad - w.shape[2])))
        return wm.reshape(w.shape[3], KS * KS * cpad).astype(matmul_dtype)

    w1m = pack(w1, Cin_p)
    w2m = pack(w2, Cout_p)

    out = pl.pallas_call(
        _make_ublock_kernel(H, W, Cout, Cout_p, Nb, n, matmul_dtype),
        out_shape=jax.ShapeDtypeStruct((G, Cout, L), jnp.float32),
        grid_spec=pltpu.PrefetchScalarGridSpec(
            num_scalar_prefetch=0,
            grid=(G,),
            in_specs=[
                pl.BlockSpec((1, Cin_p, L), lambda g: (g, 0, 0)),          # input
                pl.BlockSpec((Cout, KS * KS * Cin_p), lambda g: (0, 0)),   # conv1 W
                pl.BlockSpec((Cout, KS * KS * Cout_p), lambda g: (0, 0)),  # conv2 W
            ],
            out_specs=pl.BlockSpec((1, Cout, L), lambda g: (g, 0, 0)),
        ),
        compiler_params=pltpu.CompilerParams(
            dimension_semantics=("parallel",)),      # v7x: one group per TensorCore
    )(xf, w1m, w2m)

    # Undo the batching fold and the flat padded layout (pure layout plumbing,
    # fused under jit).
    # TODO(synk): in a full U-Net keep the flat (C, n) layout between consecutive
    # Ublocks; only unflatten at pool / upsample / concat boundaries.
    out = out.reshape(G, Cout, Nb, n).transpose(0, 2, 1, 3).reshape(N, Cout, n)
    out = out[:, :, :Hp * Wp].reshape(N, Cout, Hp, Wp)[:, :, :H, :W]
    return out                                        # NCHW


def ublock_reference(x_nchw, w1, b1, w2, b2):
    """Pure-JAX reference (NHWC conv via lax) for the correctness check."""
    x = jnp.transpose(x_nchw, (0, 2, 3, 1)).astype(jnp.float32)

    def block(x, w, b):
        y = jax.lax.conv_general_dilated(
            x, w, (1, 1), "SAME",
            dimension_numbers=("NHWC", "HWIO", "NHWC")) + b
        mean = jnp.mean(y, axis=(1, 2), keepdims=True)
        var = jnp.mean((y - mean) ** 2, axis=(1, 2), keepdims=True)
        y = (y - mean) * jax.lax.rsqrt(var + EPS)
        return jnp.maximum(y, 0.0)

    y = block(x, w1, b1)
    y = block(y, w2, b2)
    return jnp.transpose(y, (0, 3, 1, 2))


if __name__ == "__main__":
    # Ublock(in_channels=4, out_channels=8), input (N=2, C=4, H=16, W=16)
    in_ch, out_ch = 4, 8
    N, H, W = 2, 16, 16

    key = jax.random.PRNGKey(0)
    kx, kw1, kb1, kw2, kb2 = jax.random.split(key, 5)

    x = jax.random.normal(kx, (N, in_ch, H, W), dtype=jnp.float32)
    # Deterministic synthetic parameters (shapes match nn.Conv2d weights/bias,
    # stored here in HWIO layout).
    w1 = 0.1 * jax.random.normal(kw1, (KS, KS, in_ch, out_ch), dtype=jnp.float32)
    b1 = 0.1 * jax.random.normal(kb1, (out_ch,), dtype=jnp.float32)
    w2 = 0.1 * jax.random.normal(kw2, (KS, KS, out_ch, out_ch), dtype=jnp.float32)
    b2 = 0.1 * jax.random.normal(kb2, (out_ch,), dtype=jnp.float32)

    ref = jax.block_until_ready(ublock_reference(x, w1, b1, w2, b2))

    # f32 matmul, one image per grid step (v7x: both TCs via the parallel grid).
    out_a = jax.block_until_ready(
        ublock_forward(x, w1, b1, w2, b2, images_per_step=1))
    np.testing.assert_allclose(np.asarray(out_a), np.asarray(ref),
                               rtol=1e-3, atol=1e-3)

    # f32 matmul, whole batch folded into the lane axis (v5e/v6e single-TC mode).
    out_b = jax.block_until_ready(
        ublock_forward(x, w1, b1, w2, b2, images_per_step=N))
    np.testing.assert_allclose(np.asarray(out_b), np.asarray(ref),
                               rtol=1e-3, atol=1e-3)

    # bf16 matmul operands (v6e/v7x MXU-native path); f32 accumulation + norm.
    out_c = jax.block_until_ready(
        ublock_forward(x, w1, b1, w2, b2, images_per_step=N,
                       matmul_dtype=jnp.bfloat16))
    np.testing.assert_allclose(np.asarray(out_c), np.asarray(ref),
                               rtol=5e-2, atol=5e-2)

    print("KERNEL_OK")
</pallas_src>

<mosaic_0001>
module attributes {stable_mosaic.version = 11 : i64} {
  func.func @kernel(%arg0: i32, %arg1: memref<1x8x384xf32, #tpu.memory_space<vmem>>, %arg2: memref<8x72xf32, #tpu.memory_space<vmem>>, %arg3: memref<8x72xf32, #tpu.memory_space<vmem>>, %arg4: memref<1x8x384xf32, #tpu.memory_space<vmem>>) attributes {dimension_semantics = [#tpu.dimension_semantics<parallel>], iteration_bounds = array<i64: 2>, scalar_prefetch = 0 : i64, scratch_operands = 0 : i64, tpu.core_type = #tpu.core_type<tc>, window_params = [{transform_indices = @transform_0, window_bounds = array<i64: 1, 8, 384>}, {pipeline_mode = #tpu.pipeline_mode<synchronous>, transform_indices = @transform_1, window_bounds = array<i64: 8, 72>}, {pipeline_mode = #tpu.pipeline_mode<synchronous>, transform_indices = @transform_2, window_bounds = array<i64: 8, 72>}, {transform_indices = @transform_3, window_bounds = array<i64: 1, 8, 384>}]} {
    %0 = tpu.iota {dimensions = array<i32: 1>} : vector<1x384xi32>
    %1 = arith.sitofp %0 : vector<1x384xi32> to vector<1x384xf32>
    %cst = arith.constant 5.000000e-01 : f32
    %2 = vector.broadcast %cst : f32 to vector<1x384xf32>
    %3 = arith.addf %1, %2 : vector<1x384xf32>
    %cst_0 = arith.constant 0.055555556 : f32
    %4 = vector.broadcast %cst_0 : f32 to vector<1x384xf32>
    %5 = arith.mulf %3, %4 : vector<1x384xf32>
    %6 = arith.fptosi %5 : vector<1x384xf32> to vector<1x384xi32>
    %7 = arith.sitofp %6 : vector<1x384xi32> to vector<1x384xf32>
    %cst_1 = arith.constant 1.800000e+01 : f32
    %8 = vector.broadcast %cst_1 : f32 to vector<1x384xf32>
    %9 = arith.mulf %7, %8 : vector<1x384xf32>
    %10 = arith.subf %1, %9 : vector<1x384xf32>
    %cst_2 = arith.constant 3.240000e+02 : f32
    %11 = vector.broadcast %cst_2 : f32 to vector<1x384xf32>
    %12 = arith.cmpf olt, %1, %11 : vector<1x384xf32>
    %cst_3 = arith.constant 1.600000e+01 : f32
    %13 = vector.broadcast %cst_3 : f32 to vector<1x384xf32>
    %14 = arith.cmpf olt, %7, %13 : vector<1x384xf32>
    %15 = arith.andi %12, %14 : vector<1x384xi1>
    %cst_4 = arith.constant 1.600000e+01 : f32
    %16 = vector.broadcast %cst_4 : f32 to vector<1x384xf32>
    %17 = arith.cmpf olt, %10, %16 : vector<1x384xf32>
    %18 = arith.andi %15, %17 : vector<1x384xi1>
    %cst_5 = arith.constant 1.000000e+00 : f32
    %cst_6 = arith.constant 0.000000e+00 : f32
    %19 = vector.broadcast %cst_5 : f32 to vector<1x384xf32>
    %20 = vector.broadcast %cst_6 : f32 to vector<1x384xf32>
    %21 = arith.select %18, %19, %20 : vector<1x384xi1>, vector<1x384xf32>
    %c0 = arith.constant 0 : index
    %c0_7 = arith.constant 0 : index
    %c0_8 = arith.constant 0 : index
    %22 = vector.load %arg1[%c0, %c0_7, %c0_8] : memref<1x8x384xf32, #tpu.memory_space<vmem>>, vector<1x8x384xf32>
    %23 = vector.shape_cast %22 : vector<1x8x384xf32> to vector<8x384xf32>
    %c383_i32 = arith.constant 383 : i32
    %24 = tpu.dynamic_rotate %23 by %c383_i32 dim 1 : vector<8x384xf32>, i32 -> vector<8x384xf32>
    %c382_i32 = arith.constant 382 : i32
    %25 = tpu.dynamic_rotate %23 by %c382_i32 dim 1 : vector<8x384xf32>, i32 -> vector<8x384xf32>
    %c366_i32 = arith.constant 366 : i32
    %26 = tpu.dynamic_rotate %23 by %c366_i32 dim 1 : vector<8x384xf32>, i32 -> vector<8x384xf32>
    %c365_i32 = arith.constant 365 : i32
    %27 = tpu.dynamic_rotate %23 by %c365_i32 dim 1 : vector<8x384xf32>, i32 -> vector<8x384xf32>
    %c364_i32 = arith.constant 364 : i32
    %28 = tpu.dynamic_rotate %23 by %c364_i32 dim 1 : vector<8x384xf32>, i32 -> vector<8x384xf32>
    %c348_i32 = arith.constant 348 : i32
    %29 = tpu.dynamic_rotate %23 by %c348_i32 dim 1 : vector<8x384xf32>, i32 -> vector<8x384xf32>
    %c347_i32 = arith.constant 347 : i32
    %30 = tpu.dynamic_rotate %23 by %c347_i32 dim 1 : vector<8x384xf32>, i32 -> vector<8x384xf32>
    %c346_i32 = arith.constant 346 : i32
    %31 = tpu.dynamic_rotate %23 by %c346_i32 dim 1 : vector<8x384xf32>, i32 -> vector<8x384xf32>
    %32 = tpu.concatenate %23, %24, %25, %26, %27, %28, %29, %30, %31 in 0 : vector<8x384xf32>, vector<8x384xf32>, vector<8x384xf32>, vector<8x384xf32>, vector<8x384xf32>, vector<8x384xf32>, vector<8x384xf32>, vector<8x384xf32>, vector<8x384xf32> -> vector<72x384xf32>
    %c0_9 = arith.constant 0 : index
    %c0_10 = arith.constant 0 : index
    %33 = vector.load %arg2[%c0_9, %c0_10] : memref<8x72xf32, #tpu.memory_space<vmem>>, vector<8x72xf32>
    %cst_11 = arith.constant dense<0.000000e+00> : vector<8x384xf32>
    %34 = tpu.matmul %33, %32, %cst_11 {dimension_numbers = #tpu.dot_dimension_numbers<[1], [0], [0], [1], [0, 0, 1, 1], [], []>} : vector<8x72xf32>, vector<72x384xf32>, vector<8x384xf32> -> vector<8x384xf32>
    %cst_12 = arith.constant 0.000000e+00 : f32
    %35 = vector.broadcast %cst_12 : f32 to vector<8x384xf32>
    %36 = vector.broadcast %21 : vector<1x384xf32> to vector<8x384xf32>
    %37 = arith.mulf %34, %36 : vector<8x384xf32>
    %cst_13 = arith.constant dense<0.000000e+00> : vector<8xf32>
    %38 = vector.multi_reduction <add>, %37, %cst_13 [1] : vector<8x384xf32> to vector<8xf32>
    %39 = vector.shape_cast %38 : vector<8xf32> to vector<8x1xf32>
    %cst_14 = arith.constant 3.906250e-03 : f32
    %40 = vector.broadcast %cst_14 : f32 to vector<8x1xf32>
    %41 = arith.mulf %39, %40 : vector<8x1xf32>
    %42 = vector.broadcast %41 : vector<8x1xf32> to vector<8x384xf32>
    %43 = vector.broadcast %21 : vector<1x384xf32> to vector<8x384xf32>
    %44 = arith.mulf %42, %43 : vector<8x384xf32>
    %45 = arith.addf %35, %44 : vector<8x384xf32>
    %46 = arith.subf %34, %45 : vector<8x384xf32>
    %47 = vector.broadcast %21 : vector<1x384xf32> to vector<8x384xf32>
    %48 = arith.mulf %46, %47 : vector<8x384xf32>
    %49 = arith.mulf %48, %48 : vector<8x384xf32>
    %cst_15 = arith.constant 0.000000e+00 : f32
    %50 = vector.broadcast %cst_15 : f32 to vector<8x384xf32>
    %51 = vector.broadcast %21 : vector<1x384xf32> to vector<8x384xf32>
    %52 = arith.mulf %49, %51 : vector<8x384xf32>
    %cst_16 = arith.constant dense<0.000000e+00> : vector<8xf32>
    %53 = vector.multi_reduction <add>, %52, %cst_16 [1] : vector<8x384xf32> to vector<8xf32>
    %54 = vector.shape_cast %53 : vector<8xf32> to vector<8x1xf32>
    %cst_17 = arith.constant 3.906250e-03 : f32
    %55 = vector.broadcast %cst_17 : f32 to vector<8x1xf32>
    %56 = arith.mulf %54, %55 : vector<8x1xf32>
    %cst_18 = arith.constant 9.99999974E-6 : f32
    %57 = vector.broadcast %cst_18 : f32 to vector<8x1xf32>
    %58 = arith.addf %56, %57 : vector<8x1xf32>
    %59 = math.rsqrt %58 : vector<8x1xf32>
    %60 = vector.broadcast %59 : vector<8x1xf32> to vector<8x384xf32>
    %61 = vector.broadcast %21 : vector<1x384xf32> to vector<8x384xf32>
    %62 = arith.mulf %60, %61 : vector<8x384xf32>
    %63 = arith.addf %50, %62 : vector<8x384xf32>
    %64 = arith.mulf %48, %63 : vector<8x384xf32>
    %cst_19 = arith.constant 0.000000e+00 : f32
    %65 = vector.broadcast %cst_19 : f32 to vector<8x384xf32>
    %66 = arith.maximumf %64, %65 : vector<8x384xf32>
    %c19_i32 = arith.constant 19 : i32
    %67 = tpu.dynamic_rotate %66 by %c19_i32 dim 1 : vector<8x384xf32>, i32 -> vector<8x384xf32>
    %c18_i32 = arith.constant 18 : i32
    %68 = tpu.dynamic_rotate %66 by %c18_i32 dim 1 : vector<8x384xf32>, i32 -> vector<8x384xf32>
    %c17_i32 = arith.constant 17 : i32
    %69 = tpu.dynamic_rotate %66 by %c17_i32 dim 1 : vector<8x384xf32>, i32 -> vector<8x384xf32>
    %c1_i32 = arith.constant 1 : i32
    %70 = tpu.dynamic_rotate %66 by %c1_i32 dim 1 : vector<8x384xf32>, i32 -> vector<8x384xf32>
    %c383_i32_20 = arith.constant 383 : i32
    %71 = tpu.dynamic_rotate %66 by %c383_i32_20 dim 1 : vector<8x384xf32>, i32 -> vector<8x384xf32>
    %c367_i32 = arith.constant 367 : i32
    %72 = tpu.dynamic_rotate %66 by %c367_i32 dim 1 : vector<8x384xf32>, i32 -> vector<8x384xf32>
    %c366_i32_21 = arith.constant 366 : i32
    %73 = tpu.dynamic_rotate %66 by %c366_i32_21 dim 1 : vector<8x384xf32>, i32 -> vector<8x384xf32>
    %c365_i32_22 = arith.constant 365 : i32
    %74 = tpu.dynamic_rotate %66 by %c365_i32_22 dim 1 : vector<8x384xf32>, i32 -> vector<8x384xf32>
    %75 = tpu.concatenate %67, %68, %69, %70, %66, %71, %72, %73, %74 in 0 : vector<8x384xf32>, vector<8x384xf32>, vector<8x384xf32>, vector<8x384xf32>, vector<8x384xf32>, vector<8x384xf32>, vector<8x384xf32>, vector<8x384xf32>, vector<8x384xf32> -> vector<72x384xf32>
    %c0_23 = arith.constant 0 : index
    %c0_24 = arith.constant 0 : index
    %76 = vector.load %arg3[%c0_23, %c0_24] : memref<8x72xf32, #tpu.memory_space<vmem>>, vector<8x72xf32>
    %cst_25 = arith.constant dense<0.000000e+00> : vector<8x384xf32>
    %77 = tpu.matmul %76, %75, %cst_25 {dimension_numbers = #tpu.dot_dimension_numbers<[1], [0], [0], [1], [0, 0, 1, 1], [], []>} : vector<8x72xf32>, vector<72x384xf32>, vector<8x384xf32> -> vector<8x384xf32>
    %cst_26 = arith.constant 0.000000e+00 : f32
    %78 = vector.broadcast %cst_26 : f32 to vector<8x384xf32>
    %79 = vector.broadcast %21 : vector<1x384xf32> to vector<8x384xf32>
    %80 = arith.mulf %77, %79 : vector<8x384xf32>
    %cst_27 = arith.constant dense<0.000000e+00> : vector<8xf32>
    %81 = vector.multi_reduction <add>, %80, %cst_27 [1] : vector<8x384xf32> to vector<8xf32>
    %82 = vector.shape_cast %81 : vector<8xf32> to vector<8x1xf32>
    %cst_28 = arith.constant 3.906250e-03 : f32
    %83 = vector.broadcast %cst_28 : f32 to vector<8x1xf32>
    %84 = arith.mulf %82, %83 : vector<8x1xf32>
    %85 = vector.broadcast %84 : vector<8x1xf32> to vector<8x384xf32>
    %86 = vector.broadcast %21 : vector<1x384xf32> to vector<8x384xf32>
    %87 = arith.mulf %85, %86 : vector<8x384xf32>
    %88 = arith.addf %78, %87 : vector<8x384xf32>
    %89 = arith.subf %77, %88 : vector<8x384xf32>
    %90 = vector.broadcast %21 : vector<1x384xf32> to vector<8x384xf32>
    %91 = arith.mulf %89, %90 : vector<8x384xf32>
    %92 = arith.mulf %91, %91 : vector<8x384xf32>
    %cst_29 = arith.constant 0.000000e+00 : f32
    %93 = vector.broadcast %cst_29 : f32 to vector<8x384xf32>
    %94 = vector.broadcast %21 : vector<1x384xf32> to vector<8x384xf32>
    %95 = arith.mulf %92, %94 : vector<8x384xf32>
    %cst_30 = arith.constant dense<0.000000e+00> : vector<8xf32>
    %96 = vector.multi_reduction <add>, %95, %cst_30 [1] : vector<8x384xf32> to vector<8xf32>
    %97 = vector.shape_cast %96 : vector<8xf32> to vector<8x1xf32>
    %cst_31 = arith.constant 3.906250e-03 : f32
    %98 = vector.broadcast %cst_31 : f32 to vector<8x1xf32>
    %99 = arith.mulf %97, %98 : vector<8x1xf32>
    %cst_32 = arith.constant 9.99999974E-6 : f32
    %100 = vector.broadcast %cst_32 : f32 to vector<8x1xf32>
    %101 = arith.addf %99, %100 : vector<8x1xf32>
    %102 = math.rsqrt %101 : vector<8x1xf32>
    %103 = vector.broadcast %102 : vector<8x1xf32> to vector<8x384xf32>
    %104 = vector.broadcast %21 : vector<1x384xf32> to vector<8x384xf32>
    %105 = arith.mulf %103, %104 : vector<8x384xf32>
    %106 = arith.addf %93, %105 : vector<8x384xf32>
    %107 = arith.mulf %91, %106 : vector<8x384xf32>
    %cst_33 = arith.constant 0.000000e+00 : f32
    %108 = vector.broadcast %cst_33 : f32 to vector<8x384xf32>
    %109 = arith.maximumf %107, %108 : vector<8x384xf32>
    %c0_34 = arith.constant 0 : index
    %c0_35 = arith.constant 0 : index
    %c0_36 = arith.constant 0 : index
    %110 = vector.load %arg4[%c0_34, %c0_35, %c0_36] : memref<1x8x384xf32, #tpu.memory_space<vmem>>, vector<1x8x384xf32>
    %111 = vector.shape_cast %110 : vector<1x8x384xf32> to vector<8x384xf32>
    %112 = vector.shape_cast %109 : vector<8x384xf32> to vector<1x8x384xf32>
    tpu.vector_store %arg4[%c0_34, %c0_35, %c0_36], %112 {strides = array<i32>} : memref<1x8x384xf32, #tpu.memory_space<vmem>>, vector<1x8x384xf32>,
    return
  }
  func.func @transform_0(%arg0: i32) -> (i32, i32, i32) {
    %c0_i32 = arith.constant 0 : i32
    %c0_i32_0 = arith.constant 0 : i32
    %c0_i32_1 = arith.constant 0 : i32
    return %arg0, %c0_i32, %c0_i32_0 : i32, i32, i32
  }
  func.func @transform_1(%arg0: i32) -> (i32, i32) {
    %c0_i32 = arith.constant 0 : i32
    %c0_i32_0 = arith.constant 0 : i32
    %c0_i32_1 = arith.constant 0 : i32
    return %c0_i32, %c0_i32_0 : i32, i32
  }
  func.func @transform_2(%arg0: i32) -> (i32, i32) {
    %c0_i32 = arith.constant 0 : i32
    %c0_i32_0 = arith.constant 0 : i32
    %c0_i32_1 = arith.constant 0 : i32
    return %c0_i32, %c0_i32_0 : i32, i32
  }
  func.func @transform_3(%arg0: i32) -> (i32, i32, i32) {
    %c0_i32 = arith.constant 0 : i32
    %c0_i32_0 = arith.constant 0 : i32
    %c0_i32_1 = arith.constant 0 : i32
    return %arg0, %c0_i32, %c0_i32_0 : i32, i32, i32
  }
}

</mosaic_0001>

<bundles_post_ra>
// kernel: ublock_forward.1
= control target key start
LH: loop header
LB: loop body
LE: loop exit
PB: predicated region body
PF: predicated region fallthrough
CT: control target
= control target key end

     0   :  { %s965_s12 = smov 0   ;;  %s1200_s0 = inlined_call_operand.vmem [shape: f32[2,8,384], index: 0, kind: input, shape index: {}]   ;;  %s1201_s1 = inlined_call_operand.vmem [shape: f32[8,72], index: 1, kind: input, shape index: {}]   ;;  %s1202_s2 = inlined_call_operand.vmem [shape: f32[8,72], index: 2, kind: input, shape index: {}]   ;;  %s1203_s3 = inlined_call_operand.vmem [shape: f32[2,8,384], index: 3, kind: output, shape index: {}]  }
   0x1 LB: > { %s813_s13 = sadd.s32 4294967295, %s928_s12   ;;  %p817_p0 = scmp.ge.s32.totalorder %s928_s12, 1  ;;  %s928_s12 = sphi %s965_s12, %s13_s12  }
   0x2   : > { %p137_p1 = scmp.lt.s32.totalorder %s928_s12, 3 }
   0x4   : > { %p138_p2 = pnand %p817_p0, %p137_p1 }
   0x5   : > { %p161_p3 = scmp.lt.s32.totalorder (!%p138_p2), %s813_s13, 1  ;;  %s931_s18 = smov (!%p138_p2), 90  }
   0x6   : > { %141 = sbr.rel (%p138_p2) target bundleno = 1378 (0x562), region = 32  ;;  %s932_s19 = smov (!%p138_p2), 91  }
   0x7   : > { %s933_s20 = smov (!%p138_p2), 92   ;;  %s934_s21 = smov (!%p138_p2), 108  }
   0x8   : > { %s935_s22 = smov (!%p138_p2), 109   ;;  %s936_s23 = smov (!%p138_p2), 110  }
   0x9   : > { %s937_s24 = smov (!%p138_p2), 126   ;;  %s939_s25 = smov (!%p138_p2), 127  }
   0xa   : > { %s940_s28 = smov (!%p138_p2), 111   ;;  %s941_s29 = smov (!%p138_p2), 1  }
   0xb   : > { %v930_v0 = vmov 0.0   ;;  %s1216_s13 = smov (!%p161_p3, %s813_s13), 1  ;;  %vm938_vm0 = vmmov 0   ;;  %v171_v4 = vlaneseq  ;;  %v297_v54 = vld [vmem:[%s1201_s1] sm:$0xff]  ;;  %vm1204_vm9 = vcmask 588800   ;;  %s942_s30 = smov 17  }
   0xc   : > { %846 = vmatprep.subr.mxu1 %v930_v0  ;;  %366 = vmatprep.mubr.f32.mxu0 %v930_v0  ;;  %s888_s14 = smul.u32 24, %s1216_s13  ;;  %s943_s4 = smov 18  }
   0xd   : > { %864 = vmatprep.mubr.msk.f32.mxu1 %vm938_vm0, %v930_v0  ;;  %v1024_v5 = vand.u32 127, %v171_v4  ;;  %s944_s5 = smov 19  }
   0xe   : > { %s165_s17 = scalar_lea.vmem %s1200_s0, %s888_s14  ;;  %s170_s10 = scalar_lea.vmem %s1203_s3, %s888_s14 }
   0xf   : > { %v983_v1 = vld [vmem:[%s165_s17 + $0x8] sm:$0xff]  ;;  %v985_v2 = vld [vmem:[%s165_s17] sm:$0xff]  ;;  %v989_v3 = vld [vmem:[%s165_s17 + $0x10] sm:$0xff]  ;;  %vm293_vm1 = vcmp.lt.s32.totalorder %v1024_v5, 90  ;;  %vm283_vm2 = vcmp.lt.s32.totalorder %v1024_v5, 91  ;;  %vm273_vm3 = vcmp.lt.s32.totalorder %v1024_v5, 92  ;;  %v175_v57 = vcvt.s32.f32 %v1024_v5 }
  0x10   : > { %289 = vrot.lane.b32.xlu0 %v983_v1, %s931_s18  ;;  %287 = vrot.lane.b32.xlu1 %v985_v2, %s931_s18  ;;  %vm263_vm4 = vcmp.lt.s32.totalorder %v1024_v5, 108  ;;  %vm253_vm5 = vcmp.lt.s32.totalorder %v1024_v5, 109  ;;  %vm1206_vm6 = vcmp.lt.s32.totalorder %v1024_v5, 110  ;;  %vm233_vm7 = vcmp.lt.s32.totalorder %v1024_v5, 126 }
  0x11   : > { %vm1205_vm8 = vcmp.lt.s32.totalorder %v1024_v5, 127  ;;  %v173_v55 = vadd.s32 128, %v1024_v5  ;;  %v174_v56 = vadd.s32 256, %v1024_v5  ;;  %v178_v60 = vadd.f32 0.5, %v175_v57 }
  0x12   : > { %vm196_vm10 = vcmp.lt.f32.partialorder %v175_v57, 324.0 }
  0x13   : > { %v176_v58 = vcvt.s32.f32 %v173_v55  ;;  %v177_v59 = vcvt.s32.f32 %v174_v56  ;;  %v181_v63 = vmul.f32 0.055555556, %v178_v60 }
  0x14   : > { %291 = vrot.lane.b32.xlu0 %v989_v3, %s931_s18  ;;  %279 = vrot.lane.b32.xlu1 %v983_v1, %s932_s19 }
  0x15   : > { %v179_v61 = vadd.f32 0.5, %v176_v58  ;;  %v180_v62 = vadd.f32 0.5, %v177_v59  ;;  %vm197_vm12 = vcmp.lt.f32.partialorder %v176_v58, 324.0  ;;  %vm198_vm14 = vcmp.lt.f32.partialorder %v177_v59, 324.0 }
  0x18   : > { %281 = vrot.lane.b32.xlu0 %v989_v3, %s932_s19  ;;  %277 = vrot.lane.b32.xlu1 %v985_v2, %s932_s19 }
  0x1c   : > { %269 = vrot.lane.b32.xlu0 %v983_v1, %s933_s20  ;;  %271 = vrot.lane.b32.xlu1 %v989_v3, %s933_s20 }
  0x20   : > { %267 = vrot.lane.b32.xlu0 %v985_v2, %s933_s20  ;;  %259 = vrot.lane.b32.xlu1 %v983_v1, %s934_s21 }
  0x24   : > { %261 = vrot.lane.b32.xlu0 %v989_v3, %s934_s21  ;;  %257 = vrot.lane.b32.xlu1 %v985_v2, %s934_s21 }
  0x28   : > { %249 = vrot.lane.b32.xlu0 %v983_v1, %s935_s22  ;;  %251 = vrot.lane.b32.xlu1 %v989_v3, %s935_s22 }
  0x2c   : > { %247 = vrot.lane.b32.xlu0 %v985_v2, %s935_s22  ;;  %239 = vrot.lane.b32.xlu1 %v983_v1, %s936_s23 }
  0x30   : > { %241 = vrot.lane.b32.xlu0 %v989_v3, %s936_s23  ;;  %237 = vrot.lane.b32.xlu1 %v985_v2, %s936_s23 }
  0x34   : > { %229 = vrot.lane.b32.xlu0 %v983_v1, %s937_s24  ;;  %231 = vrot.lane.b32.xlu1 %v989_v3, %s937_s24 }
  0x38   : > { %227 = vrot.lane.b32.xlu0 %v985_v2, %s937_s24  ;;  %219 = vrot.lane.b32.xlu1 %v983_v1, %s939_s25 }
  0x3c   : > { %221 = vrot.lane.b32.xlu0 %v989_v3, %s939_s25  ;;  %217 = vrot.lane.b32.xlu1 %v985_v2, %s939_s25 }
  0x82   : > { %v290_v6 = vpop.permute.xlu0 %289  ;;  %v288_v7 = vpop.permute.xlu1 %287 }
  0x83   : > { %v295_v12 = vsel %vm293_vm1, %v288_v7, %v290_v6 }
  0x86   : > { %v292_v8 = vpop.permute.xlu0 %291  ;;  %v280_v9 = vpop.permute.xlu1 %279 }
  0x87   : > { %v294_v10 = vsel %vm293_vm1, %v290_v6, %v292_v8  ;;  %v296_v11 = vsel %vm293_vm1, %v292_v8, %v288_v7 }
  0x88   : > { %316 = vmatprep.subr.mxu0 %v294_v10  ;;  %847 = vmatpush3.msra.mxu1 %v296_v11 }
  0x89   : > { %317 = vmatpush1.msra.mxu0 %v295_v12  ;;  %848 = vmatprep.subr.mxu1 %v930_v0 }
  0x8a   : > { %v282_v13 = vpop.permute.xlu0 %281  ;;  %v278_v14 = vpop.permute.xlu1 %277 }
  0x8b   : > { %v284_v15 = vsel %vm283_vm2, %v280_v9, %v282_v13  ;;  %v286_v16 = vsel %vm283_vm2, %v282_v13, %v278_v14  ;;  %v285_v17 = vsel %vm283_vm2, %v278_v14, %v280_v9 }
  0x8c   : > { %318 = vmatprep.subr.mxu0 %v284_v15  ;;  %849 = vmatpush3.msra.mxu1 %v286_v16 }
  0x8d   : > { %319 = vmatpush1.msra.mxu0 %v285_v17  ;;  %850 = vmatprep.subr.mxu1 %v930_v0 }
  0x8e   : > { %v270_v18 = vpop.permute.xlu0 %269  ;;  %v272_v19 = vpop.permute.xlu1 %271 }
  0x8f   : > { %v274_v20 = vsel %vm273_vm3, %v270_v18, %v272_v19 }
  0x90   : > { %320 = vmatprep.subr.mxu0 %v274_v20 }
  0x92   : > { %v268_v21 = vpop.permute.xlu0 %267  ;;  %v260_v22 = vpop.permute.xlu1 %259 }
  0x93   : > { %v275_v23 = vsel %vm273_vm3, %v268_v21, %v270_v18  ;;  %v276_v24 = vsel %vm273_vm3, %v272_v19, %v268_v21 }
  0x94   : > { %321 = vmatpush1.msra.mxu0 %v275_v23  ;;  %851 = vmatpush3.msra.mxu1 %v276_v24 }
  0x95   : > { %852 = vmatprep.subr.mxu1 %v930_v0 }
  0x96   : > { %v262_v25 = vpop.permute.xlu0 %261  ;;  %v258_v26 = vpop.permute.xlu1 %257 }
  0x97   : > { %v264_v27 = vsel %vm263_vm4, %v260_v22, %v262_v25  ;;  %v266_v28 = vsel %vm263_vm4, %v262_v25, %v258_v26  ;;  %v265_v29 = vsel %vm263_vm4, %v258_v26, %v260_v22 }
  0x98   : > { %322 = vmatprep.subr.mxu0 %v264_v27  ;;  %853 = vmatpush3.msra.mxu1 %v266_v28 }
  0x99   : > { %323 = vmatpush1.msra.mxu0 %v265_v29  ;;  %854 = vmatprep.subr.mxu1 %v930_v0 }
  0x9a   : > { %v250_v30 = vpop.permute.xlu0 %249  ;;  %v252_v31 = vpop.permute.xlu1 %251 }
  0x9b   : > { %v254_v32 = vsel %vm253_vm5, %v250_v30, %v252_v31 }
  0x9c   : > { %324 = vmatprep.subr.mxu0 %v254_v32 }
  0x9e   : > { %v248_v33 = vpop.permute.xlu0 %247  ;;  %v240_v34 = vpop.permute.xlu1 %239 }
  0x9f   : > { %v255_v35 = vsel %vm253_vm5, %v248_v33, %v250_v30  ;;  %v256_v36 = vsel %vm253_vm5, %v252_v31, %v248_v33 }
  0xa0   : > { %325 = vmatpush1.msra.mxu0 %v255_v35  ;;  %855 = vmatpush3.msra.mxu1 %v256_v36 }
  0xa1   : > { %856 = vmatprep.subr.mxu1 %v930_v0 }
  0xa2   : > { %v242_v37 = vpop.permute.xlu0 %241  ;;  %v238_v38 = vpop.permute.xlu1 %237 }
  0xa3   : > { %v244_v39 = vsel %vm1206_vm6, %v240_v34, %v242_v37  ;;  %v246_v40 = vsel %vm1206_vm6, %v242_v37, %v238_v38  ;;  %v245_v41 = vsel %vm1206_vm6, %v238_v38, %v240_v34 }
  0xa4   : > { %326 = vmatprep.subr.mxu0 %v244_v39  ;;  %857 = vmatpush3.msra.mxu1 %v246_v40 }
  0xa5   : > { %327 = vmatpush1.msra.mxu0 %v245_v41  ;;  %858 = vmatprep.subr.mxu1 %v930_v0 }
  0xa6   : > { %v230_v42 = vpop.permute.xlu0 %229  ;;  %v232_v43 = vpop.permute.xlu1 %231 }
  0xa7   : > { %v234_v44 = vsel %vm233_vm7, %v230_v42, %v232_v43 }
  0xa8   : > { %328 = vmatprep.subr.mxu0 %v234_v44 }
  0xaa   : > { %v228_v45 = vpop.permute.xlu0 %227  ;;  %v220_v46 = vpop.permute.xlu1 %219 }
  0xab   : > { %v235_v47 = vsel %vm233_vm7, %v228_v45, %v230_v42  ;;  %v236_v48 = vsel %vm233_vm7, %v232_v43, %v228_v45 }
  0xac   : > { %329 = vmatpush1.msra.mxu0 %v235_v47  ;;  %859 = vmatpush3.msra.mxu1 %v236_v48 }
  0xad   : > { %860 = vmatprep.subr.mxu1 %v930_v0 }
  0xae   : > { %v222_v49 = vpop.permute.xlu0 %221  ;;  %v218_v50 = vpop.permute.xlu1 %217 }
  0xaf   : > { %v224_v51 = vsel %vm1205_vm8, %v220_v46, %v222_v49  ;;  %v226_v52 = vsel %vm1205_vm8, %v222_v49, %v218_v50  ;;  %v225_v53 = vsel %vm1205_vm8, %v218_v50, %v220_v46 }
  0xb0   : > { %330 = vmatprep.subr.mxu0 %v224_v51  ;;  %861 = vmatpush3.msra.mxu1 %v226_v52 }
  0xb1   : > { %331 = vmatpush1.msra.mxu0 %v225_v53  ;;  %862 = vmatprep.subr.mxu1 %v930_v0 }
  0xb2   : > { %332 = vmatprep.subr.mxu0 %v983_v1  ;;  %863 = vmatpush3.msra.mxu1 %v989_v3  ;;  %v182_v1 = vmul.f32 0.055555556, %v179_v61  ;;  %v889_v3 = vtrunc.f32 %v181_v63 }
  0xb3   : > { %333 = vmatpush1.msra.mxu0 %v985_v2  ;;  %865 = vmatmul.mubr.msk.f32.vlgmr.msra.gmra.mxu1 %vm1204_vm9, %v297_v54  ;;  %v183_v2 = vmul.f32 0.055555556, %v180_v62 }
  0xb4   : > { %820 = vmatmul.mubr.msk.f32.vlgmr.msra.gmra.mxu0 %vm1204_vm9, %v297_v54  ;;  %867 = vmatprep.subr.mxu1 %v930_v0  ;;  %v891_v4 = vtrunc.f32 %v182_v1  ;;  %v890_v7 = vcvt.f32.s32 %v889_v3 }
  0xb5   : > { %633 = vmatprep.mubr.f32.mxu0 %v930_v0  ;;  %885 = vmatprep.mubr.msk.f32.mxu1 %vm938_vm0, %v930_v0  ;;  %v893_v6 = vtrunc.f32 %v183_v2 }
  0xb6   : > { %v892_v8 = vcvt.f32.s32 %v891_v4  ;;  %v187_v10 = vcvt.s32.f32 %v890_v7 }
  0xb7   : > { %v894_v9 = vcvt.f32.s32 %v893_v6 }
  0xb8   : > { %v188_v11 = vcvt.s32.f32 %v892_v8  ;;  %v190_v13 = vmul.f32 18.0, %v187_v10  ;;  %vm199_vm11 = vcmp.lt.f32.partialorder %v187_v10, 16.0 }
  0xb9   : > { %v189_v12 = vcvt.s32.f32 %v894_v9  ;;  %vm202_vm0 = vmand %vm196_vm10, %vm199_vm11  ;;  %vm543_vm10 = vcmp.lt.s32.totalorder %v1024_v5, 111 }
  0xba   : > { %v191_v14 = vmul.f32 18.0, %v188_v11  ;;  %v193_v16 = vsub.f32 %v175_v57, %v190_v13  ;;  %vm200_vm13 = vcmp.lt.f32.partialorder %v188_v11, 16.0 }
  0xbb   : > { %v192_v15 = vmul.f32 18.0, %v189_v12  ;;  %vm201_vm15 = vcmp.lt.f32.partialorder %v189_v12, 16.0  ;;  %vm203_vm2 = vmand %vm197_vm12, %vm200_vm13  ;;  %vm524_vm13 = vcmp.lt.s32.totalorder %v1024_v5, 1 }
  0xbc   : > { %v194_v17 = vsub.f32 %v176_v58, %v191_v14  ;;  %vm205_vm1 = vcmp.lt.f32.partialorder %v193_v16, 16.0  ;;  %vm204_vm4 = vmand %vm198_vm14, %vm201_vm15  ;;  %vm514_vm14 = vcmp.lt.s32.totalorder %v1024_v5, 17  ;;  %vm504_vm15 = vcmp.lt.s32.totalorder %v1024_v5, 18 }
  0xbd   : > { %v195_v18 = vsub.f32 %v177_v59, %v192_v15  ;;  %vm208_vm9 = vmand %vm202_vm0, %vm205_vm1  ;;  %vm494_vm0 = vcmp.lt.s32.totalorder %v1024_v5, 19  ;;  %vm1213_vm1 = vcmask 588800  }
  0xbe   : > { %vm206_vm3 = vcmp.lt.f32.partialorder %v194_v17, 16.0  ;;  %v1076_v20 = vsel %vm208_vm9, 1.0, %v930_v0 }
  0xbf   : > { %vm207_vm7 = vcmp.lt.f32.partialorder %v195_v18, 16.0  ;;  %vm209_vm8 = vmand %vm203_vm2, %vm206_vm3 }
  0xc0   : > { %vm210_vm6 = vmand %vm204_vm4, %vm207_vm7  ;;  %v1079_v22 = vsel %vm209_vm8, 1.0, %v930_v0 }
  0xc1   : > { %v1082_v23 = vsel %vm210_vm6, 1.0, %v930_v0  ;;  %vm1207_vm6 = vcmp.lt.s32.totalorder %v1024_v5, 110  ;;  %vm1214_vm2 = vmmov %vm1213_vm1 }
  0xc2   : > { %vm1208_vm8 = vmmov %vm1207_vm6 }
  0xc3   : > { %vm1209_vm9 = vmmov %vm1207_vm6 }
 0x173   : > { %v439_v19 = vpop.f32.mrf.mxu1 }
 0x174   : > { %v368_v21 = vpop.f32.mrf.mxu0  ;;  %v445_v28 = vmul.f32 %v439_v19, %v1082_v23 }
 0x175   : > { %v866_v24 = vpop.f32.mrf.mxu1  ;;  %v443_v26 = vmul.f32 %v368_v21, %v1076_v20 }
 0x176   : > { %v370_v25 = vpop.f32.mrf.mxu0 }
 0x177   : > { %v444_v27 = vmul.f32 %v370_v25, %v1079_v22 }
 0x179   : > { %v446_v29 = vadd.f32 %v444_v27, %v443_v26 }
 0x17b   : > { %v447_v30 = vadd.f32 %v446_v29, %v445_v28 }
 0x17d   : > { %448 = vadd.xlane.f32.xlu0 %v447_v30 }
 0x206   : > { %v449_v31 = vpop.xlane.xlu0 %448 }
 0x207   : > { %v450_v32 = vmul.f32 0.00390625, %v449_v31 }
 0x209   : > { %v451_v33 = vmul.f32 %v450_v32, %v1076_v20  ;;  %v452_v34 = vmul.f32 %v450_v32, %v1079_v22  ;;  %v453_v35 = vmul.f32 %v450_v32, %v1082_v23 }
 0x20b   : > { %v457_v36 = vsub.f32 %v368_v21, %v451_v33  ;;  %v458_v37 = vsub.f32 %v370_v25, %v452_v34  ;;  %v459_v38 = vsub.f32 %v439_v19, %v453_v35 }
 0x20d   : > { %v460_v39 = vmul.f32 %v457_v36, %v1076_v20  ;;  %v461_v40 = vmul.f32 %v458_v37, %v1079_v22  ;;  %v462_v41 = vmul.f32 %v459_v38, %v1082_v23 }
 0x20f   : > { %v463_v42 = vmul.f32 %v460_v39, %v460_v39  ;;  %v464_v43 = vmul.f32 %v461_v40, %v461_v40  ;;  %v465_v44 = vmul.f32 %v462_v41, %v462_v41 }
 0x211   : > { %v466_v45 = vmul.f32 %v463_v42, %v1076_v20  ;;  %v467_v46 = vmul.f32 %v464_v43, %v1079_v22  ;;  %v468_v47 = vmul.f32 %v465_v44, %v1082_v23 }
 0x213   : > { %v469_v48 = vadd.f32 %v467_v46, %v466_v45 }
 0x215   : > { %v470_v49 = vadd.f32 %v469_v48, %v468_v47 }
 0x217   : > { %471 = vadd.xlane.f32.xlu1 %v470_v49 }
 0x2a0   : > { %v472_v50 = vpop.xlane.xlu1 %471 }
 0x2a1   : > { %v473_v51 = vmul.f32 0.00390625, %v472_v50 }
 0x2a3   : > { %v474_v52 = vadd.f32 1e-05, %v473_v51 }
 0x2a5   : > { %918 = vrsqrt.f32 %v474_v52  ;;  %v565_v52 = vld [vmem:[%s1202_s2] sm:$0xff] }
 0x2b2   : > { %v919_v53 = vpop.eup %918 }
 0x2b3   : > { %v476_v54 = vmul.f32 %v919_v53, %v1076_v20  ;;  %v477_v55 = vmul.f32 %v919_v53, %v1079_v22  ;;  %v478_v56 = vmul.f32 %v919_v53, %v1082_v23 }
 0x2b5   : > { %v483_v57 = vmul.f32 %v477_v55, %v461_v40  ;;  %v484_v58 = vmul.f32 %v478_v56, %v462_v41  ;;  %v482_v59 = vmul.f32 %v476_v54, %v460_v39 }
 0x2b7   : > { %v1099_v60 = vmax.f32 %v483_v57, 0.0  ;;  %v1101_v61 = vmax.f32 %v484_v58, 0.0  ;;  %v1107_v62 = vmax.f32 %v482_v59, 0.0 }
 0x2b9   : > { %560 = vrot.lane.b32.xlu1 %v1101_v61, %s935_s22  ;;  %558 = vrot.lane.b32.xlu0 %v1099_v60, %s935_s22 }
 0x2bd   : > { %549 = vrot.lane.b32.xlu1 %v1099_v60, %s936_s23  ;;  %556 = vrot.lane.b32.xlu0 %v1107_v62, %s935_s22 }
 0x2c1   : > { %547 = vrot.lane.b32.xlu1 %v1107_v62, %s936_s23  ;;  %551 = vrot.lane.b32.xlu0 %v1101_v61, %s936_s23 }
 0x2c5   : > { %541 = vrot.lane.b32.xlu1 %v1101_v61, %s940_s28  ;;  %539 = vrot.lane.b32.xlu0 %v1099_v60, %s940_s28 }
 0x2c9   : > { %530 = vrot.lane.b32.xlu1 %v1099_v60, %s939_s25  ;;  %537 = vrot.lane.b32.xlu0 %v1107_v62, %s940_s28 }
 0x2cd   : > { %528 = vrot.lane.b32.xlu1 %v1107_v62, %s939_s25  ;;  %532 = vrot.lane.b32.xlu0 %v1101_v61, %s939_s25 }
 0x2d1   : > { %520 = vrot.lane.b32.xlu1 %v1099_v60, %s941_s29  ;;  %518 = vrot.lane.b32.xlu0 %v1107_v62, %s941_s29 }
 0x2d5   : > { %508 = vrot.lane.b32.xlu1 %v1107_v62, %s942_s30  ;;  %522 = vrot.lane.b32.xlu0 %v1101_v61, %s941_s29 }
 0x2d9   : > { %512 = vrot.lane.b32.xlu1 %v1101_v61, %s942_s30  ;;  %510 = vrot.lane.b32.xlu0 %v1099_v60, %s942_s30 }
 0x2dd   : > { %500 = vrot.lane.b32.xlu1 %v1099_v60, %s943_s4  ;;  %498 = vrot.lane.b32.xlu0 %v1107_v62, %s943_s4 }
 0x2e1   : > { %488 = vrot.lane.b32.xlu1 %v1107_v62, %s944_s5  ;;  %502 = vrot.lane.b32.xlu0 %v1101_v61, %s943_s4 }
 0x2e5   : > { %492 = vrot.lane.b32.xlu1 %v1101_v61, %s944_s5  ;;  %490 = vrot.lane.b32.xlu0 %v1099_v60, %s944_s5 }
 0x32b   : > { %v561_v63 = vpop.permute.xlu1 %560  ;;  %v559_v1 = vpop.permute.xlu0 %558 }
 0x32c   : > { %v562_v2 = vsel %vm253_vm5, %v559_v1, %v561_v63 }
 0x32d   : > { %583 = vmatprep.subr.mxu0 %v562_v2 }
 0x32f   : > { %v550_v3 = vpop.permute.xlu1 %549  ;;  %v557_v4 = vpop.permute.xlu0 %556 }
 0x330   : > { %v563_v6 = vsel %vm253_vm5, %v557_v4, %v559_v1  ;;  %v564_v7 = vsel %vm253_vm5, %v561_v63, %v557_v4  ;;  %vm1210_vm5 = vcmp.lt.s32.totalorder %v1024_v5, 127 }
 0x331   : > { %584 = vmatpush1.msra.mxu0 %v563_v6  ;;  %868 = vmatpush3.msra.mxu1 %v564_v7  ;;  %vm1211_vm11 = vmmov %vm1210_vm5 }
 0x332   : > { %869 = vmatprep.subr.mxu1 %v930_v0  ;;  %vm1212_vm12 = vmmov %vm1210_vm5 }
 0x333   : > { %v548_v8 = vpop.permute.xlu1 %547  ;;  %v552_v9 = vpop.permute.xlu0 %551 }
 0x334   : > { %v554_v10 = vsel %vm1207_vm6, %v548_v8, %v550_v3  ;;  %v555_v11 = vsel %vm1208_vm8, %v552_v9, %v548_v8  ;;  %v553_v12 = vsel %vm1209_vm9, %v550_v3, %v552_v9 }
 0x335   : > { %585 = vmatprep.subr.mxu0 %v553_v12  ;;  %870 = vmatpush3.msra.mxu1 %v555_v11 }
 0x336   : > { %586 = vmatpush1.msra.mxu0 %v554_v10  ;;  %871 = vmatprep.subr.mxu1 %v930_v0 }
 0x337   : > { %v542_v13 = vpop.permute.xlu1 %541  ;;  %v540_v14 = vpop.permute.xlu0 %539 }
 0x338   : > { %v544_v15 = vsel %vm543_vm10, %v540_v14, %v542_v13 }
 0x339   : > { %587 = vmatprep.subr.mxu0 %v544_v15 }
 0x33b   : > { %v531_v16 = vpop.permute.xlu1 %530  ;;  %v538_v17 = vpop.permute.xlu0 %537 }
 0x33c   : > { %v545_v18 = vsel %vm543_vm10, %v538_v17, %v540_v14  ;;  %v546_v19 = vsel %vm543_vm10, %v542_v13, %v538_v17 }
 0x33d   : > { %588 = vmatpush1.msra.mxu0 %v545_v18  ;;  %872 = vmatpush3.msra.mxu1 %v546_v19 }
 0x33e   : > { %873 = vmatprep.subr.mxu1 %v930_v0 }
 0x33f   : > { %v529_v21 = vpop.permute.xlu1 %528  ;;  %v533_v24 = vpop.permute.xlu0 %532 }
 0x340   : > { %v535_v25 = vsel %vm1210_vm5, %v529_v21, %v531_v16  ;;  %v536_v26 = vsel %vm1211_vm11, %v533_v24, %v529_v21  ;;  %v534_v27 = vsel %vm1212_vm12, %v531_v16, %v533_v24 }
 0x341   : > { %589 = vmatprep.subr.mxu0 %v534_v27  ;;  %874 = vmatpush3.msra.mxu1 %v536_v26 }
 0x342   : > { %590 = vmatpush1.msra.mxu0 %v535_v25  ;;  %875 = vmatprep.subr.mxu1 %v930_v0 }
 0x343   : > { %v521_v28 = vpop.permute.xlu1 %520  ;;  %591 = vmatprep.subr.mxu0 %v1099_v60  ;;  %876 = vmatpush3.msra.mxu1 %v1101_v61  ;;  %v519_v29 = vpop.permute.xlu0 %518 }
 0x344   : > { %592 = vmatpush1.msra.mxu0 %v1107_v62  ;;  %v526_v30 = vsel %vm524_vm13, %v519_v29, %v521_v28  ;;  %877 = vmatprep.subr.mxu1 %v930_v0 }
 0x345   : > { %593 = vmatprep.subr.mxu0 %v526_v30 }
 0x347   : > { %v509_v31 = vpop.permute.xlu1 %508  ;;  %v523_v32 = vpop.permute.xlu0 %522 }
 0x348   : > { %v525_v33 = vsel %vm524_vm13, %v521_v28, %v523_v32  ;;  %v527_v34 = vsel %vm524_vm13, %v523_v32, %v519_v29 }
 0x349   : > { %594 = vmatpush1.msra.mxu0 %v527_v34  ;;  %878 = vmatpush3.msra.mxu1 %v525_v33 }
 0x34a   : > { %879 = vmatprep.subr.mxu1 %v930_v0 }
 0x34b   : > { %v513_v35 = vpop.permute.xlu1 %512  ;;  %v511_v36 = vpop.permute.xlu0 %510 }
 0x34c   : > { %v517_v37 = vsel %vm514_vm14, %v513_v35, %v509_v31  ;;  %v515_v38 = vsel %vm514_vm14, %v511_v36, %v513_v35  ;;  %v516_v39 = vsel %vm514_vm14, %v509_v31, %v511_v36 }
 0x34d   : > { %595 = vmatprep.subr.mxu0 %v516_v39  ;;  %880 = vmatpush3.msra.mxu1 %v515_v38 }
 0x34e   : > { %596 = vmatpush1.msra.mxu0 %v517_v37  ;;  %881 = vmatprep.subr.mxu1 %v930_v0 }
 0x34f   : > { %v501_v40 = vpop.permute.xlu1 %500  ;;  %v499_v41 = vpop.permute.xlu0 %498 }
 0x350   : > { %v506_v42 = vsel %vm504_vm15, %v499_v41, %v501_v40 }
 0x351   : > { %597 = vmatprep.subr.mxu0 %v506_v42 }
 0x353   : > { %v489_v43 = vpop.permute.xlu1 %488  ;;  %v503_v44 = vpop.permute.xlu0 %502 }
 0x354   : > { %v505_v45 = vsel %vm504_vm15, %v501_v40, %v503_v44  ;;  %v507_v46 = vsel %vm504_vm15, %v503_v44, %v499_v41 }
 0x355   : > { %598 = vmatpush1.msra.mxu0 %v507_v46  ;;  %882 = vmatpush3.msra.mxu1 %v505_v45 }
 0x356   : > { %883 = vmatprep.subr.mxu1 %v930_v0 }
 0x357   : > { %v493_v47 = vpop.permute.xlu1 %492  ;;  %v491_v48 = vpop.permute.xlu0 %490 }
 0x358   : > { %v497_v49 = vsel %vm494_vm0, %v493_v47, %v489_v43  ;;  %v495_v50 = vsel %vm494_vm0, %v491_v48, %v493_v47  ;;  %v496_v51 = vsel %vm494_vm0, %v489_v43, %v491_v48 }
 0x359   : > { %599 = vmatprep.subr.mxu0 %v496_v51  ;;  %884 = vmatpush3.msra.mxu1 %v495_v50 }
 0x35a   : > { %600 = vmatpush1.msra.mxu0 %v497_v49  ;;  %886 = vmatmul.mubr.msk.f32.vlgmr.msra.gmra.mxu1 %vm1213_vm1, %v565_v52 }
 0x35b   : > { %822 = vmatmul.mubr.msk.f32.vlgmr.msra.gmra.mxu0 %vm1214_vm2, %v565_v52 }
 0x41a   : > { %v706_v53 = vpop.f32.mrf.mxu1 }
 0x41b   : > { %v635_v5 = vpop.f32.mrf.mxu0  ;;  %v712_v57 = vmul.f32 %v706_v53, %v1082_v23 }
 0x41c   : > { %v887_v54 = vpop.f32.mrf.mxu1  ;;  %v710_v55 = vmul.f32 %v635_v5, %v1076_v20 }
 0x41d   : > { %v637_v0 = vpop.f32.mrf.mxu0 }
 0x41e   : > { %v711_v56 = vmul.f32 %v637_v0, %v1079_v22 }
 0x420   : > { %v713_v58 = vadd.f32 %v711_v56, %v710_v55 }
 0x422   : > { %v714_v59 = vadd.f32 %v713_v58, %v712_v57 }
 0x424   : > { %715 = vadd.xlane.f32.xlu0 %v714_v59 }
 0x4ad   : > { %v716_v60 = vpop.xlane.xlu0 %715 }
 0x4ae   : > { %v717_v61 = vmul.f32 0.00390625, %v716_v60 }
 0x4b0   : > { %v718_v62 = vmul.f32 %v717_v61, %v1076_v20  ;;  %v719_v63 = vmul.f32 %v717_v61, %v1079_v22  ;;  %v720_v1 = vmul.f32 %v717_v61, %v1082_v23 }
 0x4b2   : > { %v724_v2 = vsub.f32 %v635_v5, %v718_v62  ;;  %v725_v3 = vsub.f32 %v637_v0, %v719_v63  ;;  %v726_v4 = vsub.f32 %v706_v53, %v720_v1 }
 0x4b4   : > { %v727_v6 = vmul.f32 %v724_v2, %v1076_v20  ;;  %v728_v7 = vmul.f32 %v725_v3, %v1079_v22  ;;  %v729_v8 = vmul.f32 %v726_v4, %v1082_v23 }
 0x4b6   : > { %v730_v9 = vmul.f32 %v727_v6, %v727_v6  ;;  %v731_v10 = vmul.f32 %v728_v7, %v728_v7  ;;  %v732_v11 = vmul.f32 %v729_v8, %v729_v8 }
 0x4b8   : > { %v733_v12 = vmul.f32 %v730_v9, %v1076_v20  ;;  %v734_v13 = vmul.f32 %v731_v10, %v1079_v22  ;;  %v735_v14 = vmul.f32 %v732_v11, %v1082_v23 }
 0x4ba   : > { %v736_v15 = vadd.f32 %v734_v13, %v733_v12 }
 0x4bc   : > { %v737_v16 = vadd.f32 %v736_v15, %v735_v14 }
 0x4be   : > { %738 = vadd.xlane.f32.xlu1 %v737_v16 }
 0x547   : > { %v739_v17 = vpop.xlane.xlu1 %738 }
 0x548   : > { %v740_v18 = vmul.f32 0.00390625, %v739_v17 }
 0x54a   : > { %v741_v19 = vadd.f32 1e-05, %v740_v18 }
 0x54c   : > { %920 = vrsqrt.f32 %v741_v19 }
 0x559   : > { %v921_v21 = vpop.eup %920 }
 0x55a   : > { %v743_v24 = vmul.f32 %v921_v21, %v1076_v20  ;;  %v744_v25 = vmul.f32 %v921_v21, %v1079_v22  ;;  %v745_v26 = vmul.f32 %v921_v21, %v1082_v23 }
 0x55c   : > { %v749_v27 = vmul.f32 %v743_v24, %v727_v6  ;;  %v750_v28 = vmul.f32 %v744_v25, %v728_v7  ;;  %v751_v29 = vmul.f32 %v745_v26, %v729_v8 }
 0x55e   : > { %v752_v30 = vmax.f32 %v749_v27, 0.0  ;;  %v753_v31 = vmax.f32 %v750_v28, 0.0  ;;  %v754_v32 = vmax.f32 %v751_v29, 0.0 }
 0x560   : > { %755 = vst [vmem:[%s170_s10] sm:$0xff] %v752_v30  ;;  %756 = vst [vmem:[%s170_s10 + $0x8] sm:$0xff] %v753_v31 }
 0x561   : > { %757 = vst [vmem:[%s170_s10 + $0x10] sm:$0xff] %v754_v32 }
 0x562 PF: > { %s13_s12 = sadd.s32 1, %s928_s12  }
 0x563   : > { %p10_p4 = scmp.ge.s32.totalorder %s13_s12, 4  }
 0x565   :  { %12 = sbr.rel (!%p10_p4) target bundleno = 1 (0x1), region = 62 }

</bundles_post_ra>
